<compile_context>
chip_gen: v7x
topology: tpu7x:2x2x1
jax: 0.10.0
libtpu: 0.0.40
codegen_flags: <defaults>
</compile_context>

<pallas_src>
import math

import jax
import jax.numpy as jnp
from jax.experimental import pallas as pl
from jax.experimental.pallas import tpu as pltpu


def _round_up(x, m):
    return ((x + m - 1) // m) * m


def _vmem_capacity_bytes():
    """Physical per-core VMEM (128 MiB on v5e/v6e, 64 MiB on v7x); conservative fallback."""
    try:
        cap = getattr(pltpu.get_tpu_info(), "vmem_capacity_bytes", None)
        if cap:
            return int(cap)
    except Exception:
        pass
    return 64 * 2 ** 20


def _vmem_estimate(n_p, d_in_p, d_p, d_out_p, tm, a_resident):
    """Rough static VMEM footprint (pipelined buffers + scratch + in-kernel temps)."""
    a = 2 * n_p * n_p if a_resident else 3 * tm * n_p       # int8 adjacency
    x = n_p * d_in_p * 2                                     # bf16 features (single scratch copy)
    w0 = 2 * d_in_p * d_p * 2                                # bf16 first-layer weight (resident)
    w = 2 * d_p * d_p * 2                                    # bf16 per-layer weight tile
    nrm = 2 * n_p * 128 * 4                                  # (Np, 1) f32, lane-padded
    out = 2 * tm * d_out_p * 4                               # f32 output row block
    scr = 2 * n_p * d_p * 2                                  # h / hw bf16 scratch
    tmp = n_p * d_p * 4 + tm * n_p * 2 + tm * d_p * 4 + (2 << 20)   # f32 hw, bf16 A cast, agg
    return a + x + w0 + w + nrm + out + scr + tmp


def _make_gcn_kernel(tm, a_resident):
    """Fused multi-layer GCN body.  grid = (layer, row_block)."""

    def kernel(a_ref, x_hbm, w0_ref, w_ref, norm_ref, o_ref, h_scr, hw_scr, x_scr):
        l = pl.program_id(0)
        i = pl.program_id(1)
        last = pl.num_programs(0) - 1

        # Once per layer (i == 0): feature transform with the source-side norm folded in:
        #   hw <- (h @ W_l) * norm
        @pl.when((i == 0) & (l == 0))
        def _transform_first_layer():
            pltpu.sync_copy(x_hbm, x_scr)        # one-shot DMA of the input features
            hw = jnp.dot(x_scr[...], w0_ref[...], preferred_element_type=jnp.float32)
            hw_scr[...] = (hw * norm_ref[...]).astype(hw_scr.dtype)

        @pl.when((i == 0) & (l > 0))
        def _transform_later_layer():
            hw = jnp.dot(h_scr[...], w_ref[...], preferred_element_type=jnp.float32)
            hw_scr[...] = (hw * norm_ref[...]).astype(hw_scr.dtype)

        # Neighbourhood aggregation for this row block.  A is stored as exact int8 0/1
        # (half the HBM bytes of bf16) and upcast on the VPU just before the MXU dot.
        row0 = pl.multiple_of(i * tm, tm)
        if a_resident:
            a_blk = a_ref[pl.ds(row0, tm), :]
        else:
            a_blk = a_ref[...]
        agg = jnp.dot(a_blk.astype(jnp.bfloat16), hw_scr[...],
                      preferred_element_type=jnp.float32)
        agg = agg * norm_ref[pl.ds(row0, tm), :]             # destination-side norm

        @pl.when(l < last)
        def _store_hidden():                                 # ReLU on all but the last layer
            h_scr[pl.ds(row0, tm), :] = jnp.maximum(agg, 0.0).astype(h_scr.dtype)

        @pl.when(l == last)
        def _store_output():
            # Row-blocked output: earlier layers write back stale buffer contents for this
            # block, which the (outermost) last layer overwrites -- keep the layer axis
            # outermost if this grid is ever reordered.
            o_ref[...] = agg[:, : o_ref.shape[1]].astype(o_ref.dtype)

    return kernel


def gcn_forward(adj, features, weights, *, block_rows=None, force_stream=False):
    """Full GCN forward.  adj: (N, N) 0/1 with adj[v, u] = 1 iff edge u -> v."""
    n = adj.shape[0]
    in_dim = features.shape[1]
    out_widths = [w.shape[1] for w in weights]
    out_dim = out_widths[-1]
    num_layers = len(weights)
    assert num_layers >= 2, "the GCN module always stacks >= 2 GCNLayers"

    # --- padded dims: input width kept separate from the (smaller) hidden/out width.
    n_p = _round_up(n, 128)
    d_in_p = _round_up(in_dim, 128)
    d_p = _round_up(max(out_widths), 128)
    d_out_p = _round_up(out_dim, 128)

    # --- symmetric degree normalization kept as an f32 vector (applied inside the kernel).
    adj_f = adj.astype(jnp.float32)
    degs = jnp.sum(adj_f, axis=1)
    norm = jnp.power(degs, -0.5)
    norm = jnp.where(jnp.isinf(norm), 0.0, norm)             # isolated nodes -> 0
    norm_p = jnp.zeros((n_p, 1), jnp.float32).at[:n, 0].set(norm)

    # --- operands: A exact int8 0/1; features / weights zero-padded bf16.
    a_i8 = jnp.zeros((n_p, n_p), jnp.int8).at[:n, :n].set(adj_f.astype(jnp.int8))
    x_p = jnp.zeros((n_p, d_in_p), jnp.bfloat16).at[:n, :in_dim].set(
        features.astype(jnp.bfloat16))
    w0 = weights[0]
    w0_p = jnp.zeros((d_in_p, d_p), jnp.bfloat16).at[: w0.shape[0], : w0.shape[1]].set(
        w0.astype(jnp.bfloat16))
    # Slot 0 of the stack is a never-used dummy (layer 0 uses w0_p); slots 1.. are real.
    w_stack = jnp.zeros((num_layers, d_p, d_p), jnp.bfloat16)
    for li, w in enumerate(weights[1:], start=1):
        di, do = w.shape
        w_stack = w_stack.at[li, :di, :do].set(w.astype(jnp.bfloat16))

    # --- choose row-block size and A residency from the per-generation VMEM budget.
    budget = int(0.8 * _vmem_capacity_bytes())
    if block_rows is not None:
        assert n_p % block_rows == 0
        tm_candidates = [block_rows]
    else:
        tm_candidates = [t for t in (512, 256, 128) if n_p % t == 0]
    chosen = None
    for a_resident in ([False] if force_stream else [True, False]):
        for tm in tm_candidates:
            est = _vmem_estimate(n_p, d_in_p, d_p, d_out_p, tm, a_resident)
            if est <= budget:
                chosen = (a_resident, tm, est)
                break
        if chosen is not None:
            break
    if chosen is None:                                       # best effort for huge graphs
        tm = tm_candidates[-1]
        chosen = (False, tm, _vmem_estimate(n_p, d_in_p, d_p, d_out_p, tm, False))
    a_resident, tm, est = chosen
    n_row_blocks = n_p // tm
    vmem_limit = int(min(max(2 * est, 32 * 2 ** 20), budget))

    # A BlockSpec: fully VMEM-resident when it fits (one HBM read total), otherwise
    # streamed row blocks with 3-deep buffering (hides the per-layer H@W bubble).
    if a_resident:
        a_spec = pl.BlockSpec((n_p, n_p), lambda l, i: (0, 0))
    else:
        try:
            a_spec = pl.BlockSpec((tm, n_p), lambda l, i: (i, 0),
                                  pipeline_mode=pl.Buffered(3))
        except Exception:  # older API without pipeline_mode: default double buffering
            a_spec = pl.BlockSpec((tm, n_p), lambda l, i: (i, 0))

    grid_spec = pltpu.PrefetchScalarGridSpec(
        num_scalar_prefetch=0,
        grid=(num_layers, n_row_blocks),
        in_specs=[
            a_spec,                                                  # adjacency (int8 0/1)
            pl.BlockSpec(memory_space=pl.ANY),                       # features stay in HBM
            pl.BlockSpec((d_in_p, d_p), lambda l, i: (0, 0)),        # W_0 (resident)
            pl.BlockSpec((None, d_p, d_p), lambda l, i: (l, 0, 0)),  # W_l, squeezed layer dim
            pl.BlockSpec((n_p, 1), lambda l, i: (0, 0)),             # degree norm (f32)
        ],
        out_specs=pl.BlockSpec((tm, d_out_p), lambda l, i: (i, 0)),  # row-blocked output
        scratch_shapes=[
            pltpu.VMEM((n_p, d_p), jnp.bfloat16),      # hidden state h
            pltpu.VMEM((n_p, d_p), jnp.bfloat16),      # (h @ W_l) * norm for current layer
            pltpu.VMEM((n_p, d_in_p), jnp.bfloat16),   # input features (filled once)
        ],
    )

    out_p = pl.pallas_call(
        _make_gcn_kernel(tm, a_resident),
        out_shape=jax.ShapeDtypeStruct((n_p, d_out_p), jnp.float32),
        grid_spec=grid_spec,
        compiler_params=pltpu.CompilerParams(
            # Both axes carry state in VMEM scratch (h / hw), so both stay "arbitrary".
            dimension_semantics=("arbitrary", "arbitrary"),
            vmem_limit_bytes=vmem_limit,
        ),
    )(a_i8, x_p, w0_p, w_stack, norm_p)

    return out_p[:n, :out_dim]


def init_gcn_params(key, in_dim, hidden_dim, out_dim, num_layers):
    """Matches GCN.__init__ layer stack and GCNLayer.reset_parameters init."""
    dims = [(in_dim, hidden_dim)]
    dims += [(hidden_dim, hidden_dim) for _ in range(num_layers - 1)]
    dims += [(hidden_dim, out_dim)]
    weights = []
    for i, (di, do) in enumerate(dims):
        stdv = 1.0 / math.sqrt(do)
        k = jax.random.fold_in(key, i)
        weights.append(
            jax.random.uniform(k, (di, do), jnp.float32, minval=-stdv, maxval=stdv)
        )
    return weights


def _reference_forward(adj, features, weights):
    """Pure-JAX f32 reference with the original per-layer norm placement."""
    degs = jnp.sum(adj, axis=1)
    norm = jnp.power(degs, -0.5)
    norm = jnp.where(jnp.isinf(norm), 0.0, norm)[:, None]
    h = features
    n_layers = len(weights)
    for li, w in enumerate(weights):
        h = (adj @ ((h @ w) * norm)) * norm
        if li < n_layers - 1:
            h = jnp.maximum(h, 0.0)
    return h


if __name__ == "__main__":
    key = jax.random.PRNGKey(0)

    def run_case(n, in_dim, hidden_dim, out_dim, num_layers, density, case_key,
                 force_stream=False):
        k_adj, k_feat, k_w = jax.random.split(case_key, 3)
        adj = (jax.random.uniform(k_adj, (n, n)) < density).astype(jnp.float32)
        adj = jnp.maximum(adj, jnp.eye(n, dtype=jnp.float32))  # self loops
        feats = jax.random.normal(k_feat, (n, in_dim), dtype=jnp.float32)
        weights = init_gcn_params(k_w, in_dim, hidden_dim, out_dim, num_layers)

        out = jax.block_until_ready(
            gcn_forward(adj, feats, weights, force_stream=force_stream))
        ref = _reference_forward(adj, feats, weights)

        assert out.shape == (n, out_dim)
        # bf16 matmuls with f32 accumulation vs. pure-f32 reference -> loose tolerance.
        assert jnp.allclose(out, ref, atol=5e-2, rtol=5e-2), float(
            jnp.max(jnp.abs(out - ref)))

    # Case 1: tiny toy graph (N=16 -> one 128-row block, resident A, all dims pad to 128).
    run_case(16, 16, 32, 8, 2, 0.3, jax.random.fold_in(key, 0))
    # Case 2: padding + multi-row-block + distinct Din_p(128) / Dp(256) / Dout_p(128),
    #         resident-A path (N=300 -> Np=384 -> 3 row blocks).
    run_case(300, 100, 160, 20, 2, 0.1, jax.random.fold_in(key, 1))
    # Case 3: same graph but force the streamed (TM, Np) A path so it is exercised too.
    run_case(300, 100, 160, 20, 2, 0.1, jax.random.fold_in(key, 1), force_stream=True)

    print("KERNEL_OK")
</pallas_src>

<mosaic_0001>
module attributes {stable_mosaic.version = 11 : i64} {
  func.func @kernel(%arg0: i32, %arg1: i32, %arg2: memref<128x128xi8, #tpu.memory_space<vmem>>, %arg3: memref<128x128xbf16, #tpu.memory_space<any>>, %arg4: memref<128x128xbf16, #tpu.memory_space<vmem>>, %arg5: memref<1x128x128xbf16, #tpu.memory_space<vmem>>, %arg6: memref<128x1xf32, #tpu.memory_space<vmem>>, %arg7: memref<128x128xf32, #tpu.memory_space<vmem>>, %arg8: memref<128x128xbf16, #tpu.memory_space<vmem>>, %arg9: memref<128x128xbf16, #tpu.memory_space<vmem>>, %arg10: memref<128x128xbf16, #tpu.memory_space<vmem>>) attributes {dimension_semantics = [#tpu.dimension_semantics<arbitrary>, #tpu.dimension_semantics<arbitrary>], iteration_bounds = array<i64: 3, 1>, scalar_prefetch = 0 : i64, scratch_operands = 3 : i64, tpu.core_type = #tpu.core_type<tc>, window_params = [{pipeline_mode = #tpu.pipeline_mode<synchronous>, transform_indices = @transform_0, window_bounds = array<i64: 128, 128>}, {}, {pipeline_mode = #tpu.pipeline_mode<synchronous>, transform_indices = @transform_2, window_bounds = array<i64: 128, 128>}, {transform_indices = @transform_3, window_bounds = array<i64: 1, 128, 128>}, {pipeline_mode = #tpu.pipeline_mode<synchronous>, transform_indices = @transform_4, window_bounds = array<i64: 128, 1>}, {transform_indices = @transform_5, window_bounds = array<i64: 128, 128>}]} {
    %c0_i32 = arith.constant 0 : i32
    %0 = arith.cmpi eq, %arg1, %c0_i32 : i32
    %c0_i32_0 = arith.constant 0 : i32
    %1 = arith.cmpi eq, %arg0, %c0_i32_0 : i32
    %2 = arith.andi %0, %1 : i1
    %3 = arith.extui %2 : i1 to i32
    %c0_i32_1 = arith.constant 0 : i32
    %4 = arith.cmpi ne, %3, %c0_i32_1 : i32
    scf.if %4 {
      "tpu.region"() ({
        %35 = tpu.sem_alloc : memref<!tpu.dma_semaphore, #tpu.memory_space<semaphore_mem>>
        tpu.enqueue_dma source(%arg3 : memref<128x128xbf16, #tpu.memory_space<any>>) target(%arg10 : memref<128x128xbf16, #tpu.memory_space<vmem>>) target_semaphore(%35 : memref<!tpu.dma_semaphore, #tpu.memory_space<semaphore_mem>>)
        tpu.wait_dma2 semaphore(%35 : memref<!tpu.dma_semaphore, #tpu.memory_space<semaphore_mem>>) src(%arg3 : memref<128x128xbf16, #tpu.memory_space<any>>) dst(%arg10 : memref<128x128xbf16, #tpu.memory_space<vmem>>)
        tpu.yield
      }) : () -> ()
      %c0_11 = arith.constant 0 : index
      %c0_12 = arith.constant 0 : index
      %27 = vector.load %arg10[%c0_11, %c0_12] : memref<128x128xbf16, #tpu.memory_space<vmem>>, vector<128x128xbf16>
      %c0_13 = arith.constant 0 : index
      %c0_14 = arith.constant 0 : index
      %28 = vector.load %arg4[%c0_13, %c0_14] : memref<128x128xbf16, #tpu.memory_space<vmem>>, vector<128x128xbf16>
      %cst_15 = arith.constant dense<0.000000e+00> : vector<128x128xf32>
      %29 = tpu.matmul %27, %28, %cst_15 {dimension_numbers = #tpu.dot_dimension_numbers<[1], [0], [0], [1], [0, 0, 1, 1], [], []>} : vector<128x128xbf16>, vector<128x128xbf16>, vector<128x128xf32> -> vector<128x128xf32>
      %c0_16 = arith.constant 0 : index
      %c0_17 = arith.constant 0 : index
      %30 = vector.load %arg6[%c0_16, %c0_17] : memref<128x1xf32, #tpu.memory_space<vmem>>, vector<128x1xf32>
      %31 = vector.broadcast %30 : vector<128x1xf32> to vector<128x128xf32>
      %32 = arith.mulf %29, %31 : vector<128x128xf32>
      %33 = arith.truncf %32 : vector<128x128xf32> to vector<128x128xbf16>
      %c0_18 = arith.constant 0 : index
      %c0_19 = arith.constant 0 : index
      %34 = vector.load %arg9[%c0_18, %c0_19] : memref<128x128xbf16, #tpu.memory_space<vmem>>, vector<128x128xbf16>
      tpu.vector_store %arg9[%c0_18, %c0_19], %33 {strides = array<i32>} : memref<128x128xbf16, #tpu.memory_space<vmem>>, vector<128x128xbf16>,
    } else {
    }
    %c0_i32_2 = arith.constant 0 : i32
    %5 = arith.cmpi eq, %arg1, %c0_i32_2 : i32
    %c0_i32_3 = arith.constant 0 : i32
    %6 = arith.cmpi sgt, %arg0, %c0_i32_3 : i32
    %7 = arith.andi %5, %6 : i1
    %8 = arith.extui %7 : i1 to i32
    %c0_i32_4 = arith.constant 0 : i32
    %9 = arith.cmpi ne, %8, %c0_i32_4 : i32
    scf.if %9 {
      %c0_11 = arith.constant 0 : index
      %c0_12 = arith.constant 0 : index
      %27 = vector.load %arg8[%c0_11, %c0_12] : memref<128x128xbf16, #tpu.memory_space<vmem>>, vector<128x128xbf16>
      %c0_13 = arith.constant 0 : index
      %c0_14 = arith.constant 0 : index
      %c0_15 = arith.constant 0 : index
      %28 = vector.load %arg5[%c0_13, %c0_14, %c0_15] : memref<1x128x128xbf16, #tpu.memory_space<vmem>>, vector<1x128x128xbf16>
      %29 = vector.shape_cast %28 : vector<1x128x128xbf16> to vector<128x128xbf16>
      %cst_16 = arith.constant dense<0.000000e+00> : vector<128x128xf32>
      %30 = tpu.matmul %27, %29, %cst_16 {dimension_numbers = #tpu.dot_dimension_numbers<[1], [0], [0], [1], [0, 0, 1, 1], [], []>} : vector<128x128xbf16>, vector<128x128xbf16>, vector<128x128xf32> -> vector<128x128xf32>
      %c0_17 = arith.constant 0 : index
      %c0_18 = arith.constant 0 : index
      %31 = vector.load %arg6[%c0_17, %c0_18] : memref<128x1xf32, #tpu.memory_space<vmem>>, vector<128x1xf32>
      %32 = vector.broadcast %31 : vector<128x1xf32> to vector<128x128xf32>
      %33 = arith.mulf %30, %32 : vector<128x128xf32>
      %34 = arith.truncf %33 : vector<128x128xf32> to vector<128x128xbf16>
      %c0_19 = arith.constant 0 : index
      %c0_20 = arith.constant 0 : index
      %35 = vector.load %arg9[%c0_19, %c0_20] : memref<128x128xbf16, #tpu.memory_space<vmem>>, vector<128x128xbf16>
      tpu.vector_store %arg9[%c0_19, %c0_20], %34 {strides = array<i32>} : memref<128x128xbf16, #tpu.memory_space<vmem>>, vector<128x128xbf16>,
    } else {
    }
    %c128_i32 = arith.constant 128 : i32
    %10 = arith.muli %arg1, %c128_i32 : i32
    %11 = tpu.assume_multiple %10, 128 : i32
    %12 = arith.index_cast %11 : i32 to index
    %c0 = arith.constant 0 : index
    %13 = vector.load %arg2[%12, %c0] : memref<128x128xi8, #tpu.memory_space<vmem>>, vector<128x128xi8>
    %14 = arith.sitofp %13 : vector<128x128xi8> to vector<128x128xbf16>
    %c0_5 = arith.constant 0 : index
    %c0_6 = arith.constant 0 : index
    %15 = vector.load %arg9[%c0_5, %c0_6] : memref<128x128xbf16, #tpu.memory_space<vmem>>, vector<128x128xbf16>
    %cst = arith.constant dense<0.000000e+00> : vector<128x128xf32>
    %16 = tpu.matmul %14, %15, %cst {dimension_numbers = #tpu.dot_dimension_numbers<[1], [0], [0], [1], [0, 0, 1, 1], [], []>} : vector<128x128xbf16>, vector<128x128xbf16>, vector<128x128xf32> -> vector<128x128xf32>
    %17 = arith.index_cast %11 : i32 to index
    %c0_7 = arith.constant 0 : index
    %18 = vector.load %arg6[%17, %c0_7] : memref<128x1xf32, #tpu.memory_space<vmem>>, vector<128x1xf32>
    %19 = vector.broadcast %18 : vector<128x1xf32> to vector<128x128xf32>
    %20 = arith.mulf %16, %19 : vector<128x128xf32>
    %c2_i32 = arith.constant 2 : i32
    %21 = arith.cmpi slt, %arg0, %c2_i32 : i32
    %22 = arith.extui %21 : i1 to i32
    %c0_i32_8 = arith.constant 0 : i32
    %23 = arith.cmpi ne, %22, %c0_i32_8 : i32
    scf.if %23 {
      %cst_11 = arith.constant 0.000000e+00 : f32
      %27 = vector.broadcast %cst_11 : f32 to vector<128x128xf32>
      %28 = arith.maximumf %20, %27 : vector<128x128xf32>
      %29 = arith.truncf %28 : vector<128x128xf32> to vector<128x128xbf16>
      %30 = arith.index_cast %11 : i32 to index
      %c0_12 = arith.constant 0 : index
      %31 = vector.load %arg8[%30, %c0_12] : memref<128x128xbf16, #tpu.memory_space<vmem>>, vector<128x128xbf16>
      tpu.vector_store %arg8[%30, %c0_12], %29 {strides = array<i32>} : memref<128x128xbf16, #tpu.memory_space<vmem>>, vector<128x128xbf16>,
    } else {
    }
    %c2_i32_9 = arith.constant 2 : i32
    %24 = arith.cmpi eq, %arg0, %c2_i32_9 : i32
    %25 = arith.extui %24 : i1 to i32
    %c0_i32_10 = arith.constant 0 : i32
    %26 = arith.cmpi ne, %25, %c0_i32_10 : i32
    scf.if %26 {
      %c0_11 = arith.constant 0 : index
      %c0_12 = arith.constant 0 : index
      %27 = vector.load %arg7[%c0_11, %c0_12] : memref<128x128xf32, #tpu.memory_space<vmem>>, vector<128x128xf32>
      tpu.vector_store %arg7[%c0_11, %c0_12], %20 {strides = array<i32>} : memref<128x128xf32, #tpu.memory_space<vmem>>, vector<128x128xf32>,
    } else {
    }
    return
  }
  func.func @transform_0(%arg0: i32, %arg1: i32) -> (i32, i32) {
    %c0_i32 = arith.constant 0 : i32
    %c0_i32_0 = arith.constant 0 : i32
    %c0_i32_1 = arith.constant 0 : i32
    return %c0_i32, %c0_i32_0 : i32, i32
  }
  func.func @transform_2(%arg0: i32, %arg1: i32) -> (i32, i32) {
    %c0_i32 = arith.constant 0 : i32
    %c0_i32_0 = arith.constant 0 : i32
    %c0_i32_1 = arith.constant 0 : i32
    return %c0_i32, %c0_i32_0 : i32, i32
  }
  func.func @transform_3(%arg0: i32, %arg1: i32) -> (i32, i32, i32) {
    %c0_i32 = arith.constant 0 : i32
    %c0_i32_0 = arith.constant 0 : i32
    %c0_i32_1 = arith.constant 0 : i32
    return %arg0, %c0_i32, %c0_i32_0 : i32, i32, i32
  }
  func.func @transform_4(%arg0: i32, %arg1: i32) -> (i32, i32) {
    %c0_i32 = arith.constant 0 : i32
    %c0_i32_0 = arith.constant 0 : i32
    %c0_i32_1 = arith.constant 0 : i32
    return %c0_i32, %c0_i32_0 : i32, i32
  }
  func.func @transform_5(%arg0: i32, %arg1: i32) -> (i32, i32) {
    %c0_i32 = arith.constant 0 : i32
    %c0_i32_0 = arith.constant 0 : i32
    return %arg1, %c0_i32 : i32, i32
  }
}

</mosaic_0001>

<bundles_post_ra>
// kernel: tpu_custom_call.1
= control target key start
LH: loop header
LB: loop body
LE: loop exit
PB: predicated region body
PF: predicated region fallthrough
CT: control target
= control target key end

     0   :  { %10 = vsyncpa [#allocation6], 0  ;;  %s2266_s0 = inlined_call_operand.hbm [shape: s8[128,128], index: 0, kind: input, shape index: {}]   ;;  %s2267_s1 = inlined_call_operand.vmem [shape: bf16[128,128], index: 1, kind: input, shape index: {}]   ;;  %s2268_s2 = inlined_call_operand.vmem [shape: bf16[128,128], index: 2, kind: input, shape index: {}]   ;;  %s2269_s3 = inlined_call_operand.hbm [shape: bf16[3,128,128], index: 3, kind: input, shape index: {}]   ;;  %s2270_s4 = inlined_call_operand.vmem [shape: f32[128,1], index: 4, kind: input, shape index: {}]   ;;  %s2271_s5 = inlined_call_operand.hbm [shape: f32[128,128], index: 5, kind: output, shape index: {}]  }
   0x1   :  { %11 = vsyncpa [#allocation9], 0 }
   0x2   :  { %13 = vsyncpa [#allocation9 + $0x1], 0 }
   0x3   :  { %14 = vsyncpa [#allocation7], 0  ;;  %s1819_s18 = smov 0   ;;  %s1821_s19 = smov 0  }
   0x4   :  { %s1823_s20 = smov 0   ;;  %s1825_s21 = smov 0  }
   0x5   :  { %s1827_s22 = smov 0   ;;  %s1829_s23 = smov 0  }
   0x6 LB: > { %s1298_s24 = sadd.s32 4294967295, %s1775_s23   ;;  %p94_p0 = scmp.ne.s32.totalorder %s1759_s19, %s1755_s18  ;;  %s1775_s23 = sphi %s1829_s23, %s20_s23   ;;  %s1771_s22 = sphi %s1827_s22, %s2289_s22   ;;  %s1767_s21 = sphi %s1825_s21, %s2288_s21   ;;  %s1763_s20 = sphi %s1823_s20, %s2287_s20   ;;  %s1759_s19 = sphi %s1821_s19, %s2286_s19   ;;  %s1755_s18 = sphi %s1819_s18, %s2285_s18  }
   0x7   : > { %p1851_p1 = scmp.eq.s32.totalorder %s1298_s24, 0  ;;  %p1299_p2 = scmp.ge.s32.totalorder %s1775_s23, 1 }
   0x8   : > { %p152_p3 = scmp.lt.s32.totalorder %s1775_s23, 4  ;;  %s1777_s28 = smov [#allocation5]  }
   0x9   : > { %s2276_s25 = scalar_select %p1851_p1, 1, 0 }
   0xa   : > { %p1859_p4 = por %p1851_p1, %p94_p0  ;;  %p1863_p5 = pnand %p1299_p2, %p152_p3 }
   0xb   : > { %s164_s29 = sshll.u32 %s1777_s28, 4  ;;  %s32_s6 = sadd.s32 1, %s1771_s22  ;;  %s165_s29 = int_to_ptr.vmem [resolvable:$true] %s164_s29 }
   0xc   : > { %s2277_s26 = scalar_select %p1859_p4, 1, 0 }
   0xd   : > { %s2278_s27 = scalar_select %p1863_p5, 1, 0 }
   0xe   : > { %p1537_p6 = pneg %p1863_p5  ;;  %s1631_s9 = scalar_lea.hbm %s2266_s0, 512 }
   0xf   : > { %p1632_p8 = scmp.ne.s32.totalorder %s2266_s0, %s1631_s9  ;;  %p1638_p12 = scmp.lt.u32.totalorder %s1631_s9, %s2266_s0 }
  0x10   : > { %p1871_p7 = pnand %p1537_p6, %p1851_p1 }
  0x12   : > { %p1633_p9 = pneg %p1871_p7 }
  0x14   : > { %p1634_p10 = pnand %p1633_p9, %p1632_p8 }
  0x16   : > { %p1635_p11 = pneg %p1634_p10 }
  0x18   : > { %p1640_p13 = pnand %p1638_p12, %p1635_p11 }
  0x1a   : > { %1643 = shalt.err (!%p1640_p13)
}
  0x1b   : > { %s1644_s14 = scalar_lea.vmem %s165_s29, 512  ;;  %p1652_p6 = scmp.lt.s32.totalorder %s165_s29, %s165_s29 }
  0x1c   : > { %p1645_p0 = scmp.ne.s32.totalorder %s165_s29, %s1644_s14  ;;  %p1653_p4 = scmp.lt.s32.totalorder %s1644_s14, %s1644_s14 }
  0x1e   : > { %p1647_p2 = pnand %p1645_p0, %p1633_p9  ;;  %p1654_p1 = por %p1653_p4, %p1652_p6 }
  0x20   : > { %p1648_p3 = pneg %p1647_p2 }
  0x22   : > { %p1655_p5 = pnand %p1654_p1, %p1648_p3 }
  0x24   : > { %1658 = shalt.err (!%p1655_p5)
}
  0x25   : > { %s1778_s15 = smov 128   ;;  %s1779_s16 = smov 8  }
  0x26   : > { %1540 = dma.hbm_to_vmem [thread:$0]  (!%p1871_p7), %s2266_s0, 512, %s165_s29, [#allocation6], %s1778_s15, %s1778_s15, %s1779_s16  }
  0x27   : > { %p34_p4 = scmp.ge.s32.totalorder %s32_s6, 3  ;;  %s81_s28 = sadd.s32 1, %s1763_s20 }
  0x28   : > { %p88_p1 = scmp.ne.s32.totalorder %s1763_s20, %s1759_s19  ;;  %p89_p5 = scmp.eq.s32.totalorder %s1775_s23, 0 }
  0x29   : > { %s2291_s6 = smov (%p34_p4, %s32_s6), 0  ;;  %p1546_p9 = scmp.lt.s32.totalorder %s1775_s23, 3 }
  0x2a   : > { %p90_p8 = por %p89_p5, %p88_p1  ;;  %s78_s7 = ssub.s32 %s1771_s22, %s2291_s6 }
  0x2b   : > { %s184_s8 = sand.u32 1, %s1763_s20   ;;  %p79_p10 = scmp.eq.s32.totalorder %s78_s7, 0 }
  0x2c   : > { %s1302_s9 = sshll.u32 %s184_s8, 6  ;;  %s1332_s10 = sshll.u32 %s1771_s22, 10 }
  0x2d   : > { %s1904_s11 = scalar_select %p79_p10, %s1763_s20, %s81_s28  }
  0x2e   : > { %s1909_s29 = scalar_lea.hbm %s2269_s3, %s1332_s10  ;;  %s188_s13 = scalar_lea.vmem [#allocation8], %s1302_s9 }
  0x2f   : > { %s195_s14 = sshll.u32 %s188_s13, 4  ;;  %p1911_p7 = pnand %p1546_p9, %p90_p8  ;;  %s1915_s14 = int_to_ptr.vmem [resolvable:$true] %s195_s14 }
  0x30   : > { %s1917_s16 = scalar_lea.sflag [#allocation9], %s184_s8  ;;  %s1659_s17 = scalar_lea.hbm %s1909_s29, 1024 }
  0x31   : > { %p1660_p11 = scmp.ne.s32.totalorder %s1909_s29, %s1659_s17  ;;  %p1661_p12 = pneg %p1911_p7 }
  0x32   : > { %s1664_s7 = scalar_lea.hbm %s2269_s3, 3072  ;;  %p1665_p2 = scmp.lt.u32.totalorder %s1909_s29, %s2269_s3 }
  0x33   : > { %p1662_p13 = pnand %p1661_p12, %p1660_p11  ;;  %p1666_p3 = scmp.lt.u32.totalorder %s1664_s7, %s1659_s17 }
  0x34   : > { %p1668_p4 = scmp.lt.u32.totalorder %s1659_s17, %s1909_s29 }
  0x35   : > { %p1663_p0 = pneg %p1662_p13  ;;  %p1667_p6 = por %p1666_p3, %p1665_p2 }
  0x37   : > { %p1669_p1 = por %p1668_p4, %p1667_p6 }
  0x39   : > { %p1670_p5 = pnand %p1669_p1, %p1663_p0 }
  0x3b   : > { %1673 = shalt.err (!%p1670_p5)
}
  0x3c   : > { %s1674_s8 = scalar_lea.vmem %s1915_s14, 1024  ;;  %s1780_s30 = smov [#allocation8]  }
  0x3d   : > { %p1675_p8 = scmp.ne.s32.totalorder %s1915_s14, %s1674_s8  ;;  %s1679_s12 = sshll.u32 %s1780_s30, 4  ;;  %s1680_s12 = int_to_ptr.vmem [resolvable:$false] %s1679_s12 }
  0x3e   : > { %s1681_s13 = scalar_lea.vmem %s1680_s12, 2048  ;;  %p1682_p11 = scmp.lt.s32.totalorder %s1915_s14, %s1680_s12 }
  0x3f   : > { %p1677_p9 = pnand %p1675_p8, %p1661_p12  ;;  %p1683_p13 = scmp.lt.s32.totalorder %s1681_s13, %s1674_s8 }
  0x41   : > { %p1678_p10 = pneg %p1677_p9  ;;  %p1684_p2 = por %p1683_p13, %p1682_p11 }
  0x43   : > { %p1685_p3 = pnand %p1684_p2, %p1678_p10 }
  0x45   : > { %1688 = shalt.err (!%p1685_p3)
}
  0x46   : > { %s1781_s17 = smov 64   ;;  %s1782_s18 = smov 4  }
  0x47   : > { %1544 = dma.hbm_to_vmem [thread:$0]  (!%p1911_p7), %s1909_s29, 1024, %s1915_s14, %s1917_s16, %s1781_s17, %s1781_s17, %s1782_s18  }
  0x48   : > { %p2281_p12 = scmp.ne.s32.totalorder %s2278_s27, 0 }
  0x49   : > { %p2282_p0 = scmp.ne.s32.totalorder (!%p2281_p12), %s2276_s25, 0 }
  0x4a   : > { %207 = sbr.rel (%p2281_p12) target bundleno = 923 (0x39b), region = 36 }
  0x51   : > { %1740 = dma.done.wait (%p2282_p0), [#allocation6], 512  }
  0x52   : > { %1742 = vsyncadd (%p2282_p0), [#allocation6], 4294966784  ;;  %s213_s28 = sand.u32 1, %s1759_s19   ;;  %p2283_p6 = scmp.ne.s32.totalorder %s2277_s26, 0 }
  0x53   : > { %s1307_s7 = sshll.u32 %s213_s28, 6  ;;  %s214_s9 = scalar_lea.sflag [#allocation9], %s213_s28 }
  0x54   : > { %s1952_s10 = scalar_lea.vmem [#allocation8], %s1307_s7 }
  0x55   : > { %1744 = dma.done.wait (%p2283_p6), %s214_s9, 1024  }
  0x56   : > { %1746 = vsyncadd (%p2283_p6), %s214_s9, 4294966272  ;;  %p240_p7 = scmp.eq.s32.totalorder %s1767_s21, 0 }
  0x58   : > { %244 = sbr.rel (!%p240_p7) target bundleno = 362 (0x16a), region = 48 }
  0x5f   : > { %v277_v0 = vld [vmem:[%s2267_s1] sm:$0xff]  ;;  %v1965_v1 = vld [vmem:[%s2267_s1 + $0x8] sm:$0xff]  ;;  %v1970_v2 = vld [vmem:[%s2267_s1 + $0x10] sm:$0xff] }
  0x60   : > { %v1975_v3 = vld [vmem:[%s2267_s1 + $0x18] sm:$0xff]  ;;  %v285_v4 = vld [vmem:[%s2267_s1 + $0x20] sm:$0xff]  ;;  %v1983_v5 = vld [vmem:[%s2267_s1 + $0x28] sm:$0xff] }
  0x61   : > { %v1988_v6 = vld [vmem:[%s2267_s1 + $0x30] sm:$0xff]  ;;  %v1993_v7 = vld [vmem:[%s2267_s1 + $0x38] sm:$0xff] }
  0x62   : > { %300 = vsyncadd [#allocation11], 1024 }
  0x63   : > { %1747 = dma.done.wait [#allocation11], 1024 }
  0x64   : > { %1748 = vsyncadd [#allocation11], 4294966272  ;;  %v1611_v8 = vld [vmem:[%s2268_s2] sm:$0xff]   ;;  %1399 = vmatprep.mubr.bf16.mxu0 %v277_v0  ;;  %1407 = vmatprep.mubr.bf16.mxu1 %v285_v4  ;;  %v1612_v9 = vld [vmem:[%s2268_s2 + $0x8] sm:$0xff]   ;;  %v1783_v10 = vmov 0  }
  0x65   : > { %1610 = vset.pattern.permute.xlu1 %v1783_v10  ;;  %1609 = vset.pattern.permute.xlu0 %v1783_v10  ;;  %v1613_v11 = vld [vmem:[%s2268_s2 + $0x10] sm:$0xff]   ;;  %v1614_v12 = vld [vmem:[%s2268_s2 + $0x18] sm:$0xff]   ;;  %v474_v14 = vld [vmem:[%s2270_s4] sm:$0xff] }
  0x66   : > { %1383 = vmatprep.subr.bf16.mxu0 %v1611_v8  ;;  %1479 = vmatprep.subr.bf16.mxu1 %v1611_v8  ;;  %v476_v13 = vld [vmem:[%s2270_s4 + $0x10] sm:$0xff]  ;;  %v477_v15 = vld [vmem:[%s2270_s4 + $0x18] sm:$0xff]  ;;  %v475_v16 = vld [vmem:[%s2270_s4 + $0x8] sm:$0xff] }
  0x67   : > { %1384 = vmatpush3.bf16.msra.mxu0 %v1611_v8  ;;  %1487 = vmatpush3.bf16.msra.mxu1 %v1611_v8  ;;  %v1615_v17 = vld [vmem:[%s2268_s2 + $0x20] sm:$0xff]   ;;  %v479_v18 = vld [vmem:[%s2270_s4 + $0x28] sm:$0xff]  ;;  %v481_v21 = vld [vmem:[%s2270_s4 + $0x38] sm:$0xff] }
  0x68   : > { %1385 = vmatprep.subr.bf16.mxu0 %v1612_v9  ;;  %1480 = vmatprep.subr.bf16.mxu1 %v1612_v9  ;;  %v478_v19 = vld [vmem:[%s2270_s4 + $0x20] sm:$0xff]  ;;  %v1616_v20 = vld [vmem:[%s2268_s2 + $0x28] sm:$0xff]   ;;  %v480_v22 = vld [vmem:[%s2270_s4 + $0x30] sm:$0xff] }
  0x69   : > { %502 = vperm.xlu1 %1610, %v476_v13   ;;  %492 = vperm.xlu0 %1609, %v474_v14   ;;  %v1617_v23 = vld [vmem:[%s2268_s2 + $0x30] sm:$0xff]   ;;  %v483_v24 = vld [vmem:[%s2270_s4 + $0x48] sm:$0xff]  ;;  %v482_v25 = vld [vmem:[%s2270_s4 + $0x40] sm:$0xff] }
  0x6a   : > { %v1618_v26 = vld [vmem:[%s2268_s2 + $0x38] sm:$0xff]   ;;  %v484_v28 = vld [vmem:[%s2270_s4 + $0x50] sm:$0xff]  ;;  %v487_v29 = vld [vmem:[%s2270_s4 + $0x68] sm:$0xff] }
  0x6b   : > { %1386 = vmatpush3.bf16.msra.mxu0 %v1612_v9  ;;  %1488 = vmatpush3.bf16.msra.mxu1 %v1612_v9  ;;  %v485_v27 = vld [vmem:[%s2270_s4 + $0x58] sm:$0xff]  ;;  %v486_v30 = vld [vmem:[%s2270_s4 + $0x60] sm:$0xff]  ;;  %v488_v32 = vld [vmem:[%s2270_s4 + $0x70] sm:$0xff] }
  0x6c   : > { %1387 = vmatprep.subr.bf16.mxu0 %v1613_v11  ;;  %1481 = vmatprep.subr.bf16.mxu1 %v1613_v11  ;;  %v489_v31 = vld [vmem:[%s2270_s4 + $0x78] sm:$0xff] }
  0x6d   : > { %507 = vperm.xlu1 %1610, %v477_v15   ;;  %497 = vperm.xlu0 %1609, %v475_v16  }
  0x6f   : > { %1388 = vmatpush3.bf16.msra.mxu0 %v1613_v11  ;;  %1489 = vmatpush3.bf16.msra.mxu1 %v1613_v11 }
  0x70   : > { %1389 = vmatprep.subr.bf16.mxu0 %v1614_v12  ;;  %1482 = vmatprep.subr.bf16.mxu1 %v1614_v12 }
  0x71   : > { %517 = vperm.xlu1 %1610, %v479_v18   ;;  %512 = vperm.xlu0 %1609, %v478_v19  }
  0x73   : > { %1390 = vmatpush3.bf16.msra.mxu0 %v1614_v12  ;;  %1490 = vmatpush3.bf16.msra.mxu1 %v1614_v12 }
  0x74   : > { %1391 = vmatprep.subr.bf16.mxu0 %v1615_v17  ;;  %1483 = vmatprep.subr.bf16.mxu1 %v1615_v17 }
  0x75   : > { %527 = vperm.xlu1 %1610, %v481_v21   ;;  %522 = vperm.xlu0 %1609, %v480_v22  }
  0x77   : > { %1392 = vmatpush3.bf16.msra.mxu0 %v1615_v17  ;;  %1491 = vmatpush3.bf16.msra.mxu1 %v1615_v17 }
  0x78   : > { %1393 = vmatprep.subr.bf16.mxu0 %v1616_v20  ;;  %1484 = vmatprep.subr.bf16.mxu1 %v1616_v20 }
  0x79   : > { %537 = vperm.xlu1 %1610, %v483_v24   ;;  %532 = vperm.xlu0 %1609, %v482_v25  }
  0x7b   : > { %1394 = vmatpush3.bf16.msra.mxu0 %v1616_v20  ;;  %1492 = vmatpush3.bf16.msra.mxu1 %v1616_v20 }
  0x7c   : > { %1395 = vmatprep.subr.bf16.mxu0 %v1617_v23  ;;  %1485 = vmatprep.subr.bf16.mxu1 %v1617_v23 }
  0x7d   : > { %547 = vperm.xlu1 %1610, %v485_v27   ;;  %542 = vperm.xlu0 %1609, %v484_v28  }
  0x7f   : > { %1396 = vmatpush3.bf16.msra.mxu0 %v1617_v23  ;;  %1493 = vmatpush3.bf16.msra.mxu1 %v1617_v23 }
  0x80   : > { %1397 = vmatprep.subr.bf16.mxu0 %v1618_v26  ;;  %1486 = vmatprep.subr.bf16.mxu1 %v1618_v26 }
  0x81   : > { %557 = vperm.xlu1 %1610, %v487_v29   ;;  %552 = vperm.xlu0 %1609, %v486_v30  }
  0x83   : > { %1398 = vmatpush3.bf16.msra.mxu0 %v1618_v26  ;;  %1494 = vmatpush3.bf16.msra.mxu1 %v1618_v26 }
  0x85   : > { %567 = vperm.xlu1 %1610, %v489_v31   ;;  %562 = vperm.xlu0 %1609, %v488_v32  }
  0x86   : > { %1400 = vmatmul.mubr.bf16.vlgmr.msra.gmra.mrb[0].mxu0 %v1965_v1  ;;  %1408 = vmatmul.mubr.bf16.vlgmr.msra.gmra.mrb[0].mxu1 %v1983_v5 }
  0x87   : > { %1403 = vmatprep.mubr.bf16.mxu0 %v1970_v2  ;;  %1411 = vmatprep.mubr.bf16.mxu1 %v1988_v6 }
  0x8e   : > { %1404 = vmatmul.mubr.bf16.gmra.mrb[4].mxu0 %v1975_v3  ;;  %1412 = vmatmul.mubr.bf16.gmra.mrb[4].mxu1 %v1993_v7 }
  0xe8   : > { %v503_v33 = vpop.permute.xlu1 %502  ;;  %v493_v34 = vpop.permute.xlu0 %492 }
  0xec   : > { %v508_v35 = vpop.permute.xlu1 %507  ;;  %v498_v36 = vpop.permute.xlu0 %497 }
  0xf0   : > { %v518_v37 = vpop.permute.xlu1 %517  ;;  %v513_v38 = vpop.permute.xlu0 %512 }
  0xf4   : > { %v528_v39 = vpop.permute.xlu1 %527  ;;  %v523_v40 = vpop.permute.xlu0 %522 }
  0xf8   : > { %v538_v41 = vpop.permute.xlu1 %537  ;;  %v533_v42 = vpop.permute.xlu0 %532 }
  0xfc   : > { %v548_v43 = vpop.permute.xlu1 %547  ;;  %v543_v44 = vpop.permute.xlu0 %542 }
 0x100   : > { %v558_v45 = vpop.permute.xlu1 %557  ;;  %v553_v46 = vpop.permute.xlu0 %552 }
 0x104   : > { %v568_v3 = vpop.permute.xlu1 %567  ;;  %v563_v4 = vpop.permute.xlu0 %562 }
 0x159   : > { %v1401_v47 = vpop.f32.mrb[0].mxu0  ;;  %v1409_v48 = vpop.f32.mrb[0].mxu1 }
 0x15a   : > { %v411_v49 = vpop.f32.mrb[1].mxu0  ;;  %v443_v50 = vpop.f32.mrb[1].mxu1  ;;  %v572_v53 = vmul.f32 %v1401_v47, %v503_v33  ;;  %v580_v54 = vmul.f32 %v1409_v48, %v543_v44 }
 0x15b   : > { %v1402_v51 = vpop.f32.mrb[2].mxu0  ;;  %v1410_v52 = vpop.f32.mrb[2].mxu1  ;;  %v570_v59 = vmul.f32 %v493_v34, %v411_v49  ;;  %v578_v60 = vmul.f32 %v533_v42, %v443_v50 }
 0x15c   : > { %v573_v55 = vmul.f32 %v1402_v51, %v508_v35  ;;  %v581_v56 = vmul.f32 %v1410_v52, %v548_v43  ;;  %v414_v57 = vpop.f32.mrb[3].mxu0  ;;  %v446_v58 = vpop.f32.mrb[3].mxu1 }
 0x15d   : > { %v571_v61 = vmul.f32 %v498_v36, %v414_v57  ;;  %v579_v62 = vmul.f32 %v538_v41, %v446_v58 }
 0x15e   : > { %v587_v63 = vpack.c.bf16 %v573_v55, %v572_v53  ;;  %v591_v0 = vpack.c.bf16 %v581_v56, %v580_v54 }
 0x15f   : > { %v586_v1 = vpack.c.bf16 %v571_v61, %v570_v59  ;;  %v590_v2 = vpack.c.bf16 %v579_v62, %v578_v60 }
 0x160   : > { %595 = vst [vmem:[#allocation3 + $0x8] sm:$0xff] %v587_v63  ;;  %599 = vst [vmem:[#allocation3 + $0x28] sm:$0xff] %v591_v0 }
 0x161   : > { %594 = vst [vmem:[#allocation3] sm:$0xff] %v586_v1  ;;  %598 = vst [vmem:[#allocation3 + $0x20] sm:$0xff] %v590_v2  ;;  %v1405_v5 = vpop.f32.mrb[4].mxu0  ;;  %v1413_v6 = vpop.f32.mrb[4].mxu1 }
 0x162   : > { %v427_v7 = vpop.f32.mrb[5].mxu0  ;;  %v459_v8 = vpop.f32.mrb[5].mxu1  ;;  %v576_v11 = vmul.f32 %v1405_v5, %v523_v40  ;;  %v584_v12 = vmul.f32 %v1413_v6, %v563_v4 }
 0x163   : > { %v1406_v9 = vpop.f32.mrb[6].mxu0  ;;  %v1414_v10 = vpop.f32.mrb[6].mxu1  ;;  %v574_v17 = vmul.f32 %v513_v38, %v427_v7  ;;  %v582_v18 = vmul.f32 %v553_v46, %v459_v8 }
 0x164   : > { %v577_v13 = vmul.f32 %v1406_v9, %v528_v39  ;;  %v585_v14 = vmul.f32 %v1414_v10, %v568_v3  ;;  %v430_v15 = vpop.f32.mrb[7].mxu0  ;;  %v462_v16 = vpop.f32.mrb[7].mxu1 }
 0x165   : > { %v575_v19 = vmul.f32 %v518_v37, %v430_v15  ;;  %v583_v20 = vmul.f32 %v558_v45, %v462_v16 }
 0x166   : > { %v589_v21 = vpack.c.bf16 %v577_v13, %v576_v11  ;;  %v593_v22 = vpack.c.bf16 %v585_v14, %v584_v12 }
 0x167   : > { %v588_v23 = vpack.c.bf16 %v575_v19, %v574_v17  ;;  %v592_v24 = vpack.c.bf16 %v583_v20, %v582_v18 }
 0x168   : > { %597 = vst [vmem:[#allocation3 + $0x18] sm:$0xff] %v589_v21  ;;  %601 = vst [vmem:[#allocation3 + $0x38] sm:$0xff] %v593_v22 }
 0x169   : > { %596 = vst [vmem:[#allocation3 + $0x10] sm:$0xff] %v588_v23  ;;  %600 = vst [vmem:[#allocation3 + $0x30] sm:$0xff] %v592_v24 }
 0x16a PF: > { %p602_p4 = scmp.gt.s32.totalorder %s1767_s21, 0 }
 0x16b   : > { %v1621_v25 = vld [vmem:[%s1952_s10] sm:$0xff] (%p602_p4)   ;;  %v1622_v26 = vld [vmem:[%s1952_s10 + $0x8] sm:$0xff] (%p602_p4)   ;;  %v1784_v27 = vmov (%p602_p4), 0   ;;  %v1623_v28 = vld [vmem:[%s1952_s10 + $0x10] sm:$0xff] (%p602_p4)  }
 0x16c   : > { %606 = sbr.rel (!%p602_p4) target bundleno = 625 (0x271), region = 87  ;;  %1620 = vset.pattern.permute.xlu1 (%p602_p4), %v1784_v27  ;;  %1619 = vset.pattern.permute.xlu0 (%p602_p4), %v1784_v27  ;;  %v1624_v29 = vld [vmem:[%s1952_s10 + $0x18] sm:$0xff] (%p602_p4)   ;;  %v607_v30 = vld [vmem:[#allocation2] sm:$0xff] (%p602_p4)  ;;  %v778_v32 = vld [vmem:[%s2270_s4 + $0x10] sm:$0xff] (%p602_p4) }
 0x16d   : > { %1415 = vmatprep.subr.bf16.mxu0 (%p602_p4), %v1621_v25  ;;  %1495 = vmatprep.subr.bf16.mxu1 (%p602_p4), %v1621_v25  ;;  %v611_v31 = vld [vmem:[#allocation2 + $0x20] sm:$0xff] (%p602_p4)  ;;  %v779_v35 = vld [vmem:[%s2270_s4 + $0x18] sm:$0xff] (%p602_p4)  ;;  %v777_v36 = vld [vmem:[%s2270_s4 + $0x8] sm:$0xff] (%p602_p4) }
 0x16e   : > { %1416 = vmatpush3.bf16.msra.mxu0 (%p602_p4), %v1621_v25  ;;  %1503 = vmatpush3.bf16.msra.mxu1 (%p602_p4), %v1621_v25  ;;  %v776_v33 = vld [vmem:[%s2270_s4] sm:$0xff] (%p602_p4)  ;;  %v1626_v37 = vld [vmem:[%s1952_s10 + $0x28] sm:$0xff] (%p602_p4)   ;;  %v1627_v40 = vld [vmem:[%s1952_s10 + $0x30] sm:$0xff] (%p602_p4)  }
 0x16f   : > { %1417 = vmatprep.subr.bf16.mxu0 (%p602_p4), %v1622_v26  ;;  %1496 = vmatprep.subr.bf16.mxu1 (%p602_p4), %v1622_v26  ;;  %v1625_v34 = vld [vmem:[%s1952_s10 + $0x20] sm:$0xff] (%p602_p4)   ;;  %v781_v38 = vld [vmem:[%s2270_s4 + $0x28] sm:$0xff] (%p602_p4)  ;;  %v783_v41 = vld [vmem:[%s2270_s4 + $0x38] sm:$0xff] (%p602_p4) }
 0x170   : > { %1431 = vmatprep.mubr.bf16.mxu0 (%p602_p4), %v607_v30  ;;  %1439 = vmatprep.mubr.bf16.mxu1 (%p602_p4), %v611_v31  ;;  %v780_v39 = vld [vmem:[%s2270_s4 + $0x20] sm:$0xff] (%p602_p4)  ;;  %v782_v42 = vld [vmem:[%s2270_s4 + $0x30] sm:$0xff] (%p602_p4)  ;;  %v1628_v43 = vld [vmem:[%s1952_s10 + $0x38] sm:$0xff] (%p602_p4)  }
 0x171   : > { %804 = vperm.xlu1 (%p602_p4), %1620, %v778_v32   ;;  %794 = vperm.xlu0 (%p602_p4), %1619, %v776_v33   ;;  %v785_v44 = vld [vmem:[%s2270_s4 + $0x48] sm:$0xff] (%p602_p4)  ;;  %v784_v45 = vld [vmem:[%s2270_s4 + $0x40] sm:$0xff] (%p602_p4)  ;;  %v787_v46 = vld [vmem:[%s2270_s4 + $0x58] sm:$0xff] (%p602_p4) }
 0x172   : > { %1418 = vmatpush3.bf16.msra.mxu0 (%p602_p4), %v1622_v26  ;;  %1504 = vmatpush3.bf16.msra.mxu1 (%p602_p4), %v1622_v26  ;;  %v786_v47 = vld [vmem:[%s2270_s4 + $0x50] sm:$0xff] (%p602_p4)  ;;  %v608_v48 = vld [vmem:[#allocation2 + $0x8] sm:$0xff] (%p602_p4)  ;;  %v788_v53 = vld [vmem:[%s2270_s4 + $0x60] sm:$0xff] (%p602_p4) }
 0x173   : > { %1419 = vmatprep.subr.bf16.mxu0 %v1623_v28  ;;  %1497 = vmatprep.subr.bf16.mxu1 %v1623_v28  ;;  %v612_v49 = vld [vmem:[#allocation2 + $0x28] sm:$0xff]  ;;  %v609_v50 = vld [vmem:[#allocation2 + $0x10] sm:$0xff]  ;;  %v791_v54 = vld [vmem:[%s2270_s4 + $0x78] sm:$0xff] }
 0x174   : > { %v613_v51 = vld [vmem:[#allocation2 + $0x30] sm:$0xff]  ;;  %v789_v52 = vld [vmem:[%s2270_s4 + $0x68] sm:$0xff]  ;;  %v610_v56 = vld [vmem:[#allocation2 + $0x18] sm:$0xff] }
 0x175   : > { %809 = vperm.xlu1 %1620, %v779_v35   ;;  %799 = vperm.xlu0 %1619, %v777_v36   ;;  %v790_v55 = vld [vmem:[%s2270_s4 + $0x70] sm:$0xff]  ;;  %v614_v57 = vld [vmem:[#allocation2 + $0x38] sm:$0xff] }
 0x176   : > { %1420 = vmatpush3.bf16.msra.mxu0 %v1623_v28  ;;  %1505 = vmatpush3.bf16.msra.mxu1 %v1623_v28 }
 0x177   : > { %1421 = vmatprep.subr.bf16.mxu0 %v1624_v29  ;;  %1498 = vmatprep.subr.bf16.mxu1 %v1624_v29 }
 0x179   : > { %819 = vperm.xlu1 %1620, %v781_v38   ;;  %814 = vperm.xlu0 %1619, %v780_v39  }
 0x17a   : > { %1422 = vmatpush3.bf16.msra.mxu0 %v1624_v29  ;;  %1506 = vmatpush3.bf16.msra.mxu1 %v1624_v29 }
 0x17b   : > { %1423 = vmatprep.subr.bf16.mxu0 %v1625_v34  ;;  %1499 = vmatprep.subr.bf16.mxu1 %v1625_v34 }
 0x17d   : > { %829 = vperm.xlu1 %1620, %v783_v41   ;;  %824 = vperm.xlu0 %1619, %v782_v42  }
 0x17e   : > { %1424 = vmatpush3.bf16.msra.mxu0 %v1625_v34  ;;  %1507 = vmatpush3.bf16.msra.mxu1 %v1625_v34 }
 0x17f   : > { %1425 = vmatprep.subr.bf16.mxu0 %v1626_v37  ;;  %1500 = vmatprep.subr.bf16.mxu1 %v1626_v37 }
 0x181   : > { %839 = vperm.xlu1 %1620, %v785_v44   ;;  %834 = vperm.xlu0 %1619, %v784_v45  }
 0x182   : > { %1426 = vmatpush3.bf16.msra.mxu0 %v1626_v37  ;;  %1508 = vmatpush3.bf16.msra.mxu1 %v1626_v37 }
 0x183   : > { %1427 = vmatprep.subr.bf16.mxu0 %v1627_v40  ;;  %1501 = vmatprep.subr.bf16.mxu1 %v1627_v40 }
 0x185   : > { %849 = vperm.xlu1 %1620, %v787_v46   ;;  %844 = vperm.xlu0 %1619, %v786_v47  }
 0x186   : > { %1428 = vmatpush3.bf16.msra.mxu0 %v1627_v40  ;;  %1509 = vmatpush3.bf16.msra.mxu1 %v1627_v40 }
 0x187   : > { %1429 = vmatprep.subr.bf16.mxu0 %v1628_v43  ;;  %1502 = vmatprep.subr.bf16.mxu1 %v1628_v43 }
 0x189   : > { %859 = vperm.xlu1 %1620, %v789_v52   ;;  %854 = vperm.xlu0 %1619, %v788_v53  }
 0x18a   : > { %1430 = vmatpush3.bf16.msra.mxu0 %v1628_v43  ;;  %1510 = vmatpush3.bf16.msra.mxu1 %v1628_v43 }
 0x18d   : > { %1432 = vmatmul.mubr.bf16.vlgmr.msra.gmra.mrb[0].mxu0 %v608_v48  ;;  %1440 = vmatmul.mubr.bf16.vlgmr.msra.gmra.mrb[0].mxu1 %v612_v49 }
 0x18e   : > { %1435 = vmatprep.mubr.bf16.mxu0 %v609_v50  ;;  %1443 = vmatprep.mubr.bf16.mxu1 %v613_v51 }
 0x18f   : > { %869 = vperm.xlu1 %1620, %v791_v54   ;;  %864 = vperm.xlu0 %1619, %v790_v55  }
 0x195   : > { %1436 = vmatmul.mubr.bf16.gmra.mrb[4].mxu0 %v610_v56  ;;  %1444 = vmatmul.mubr.bf16.gmra.mrb[4].mxu1 %v614_v57 }
 0x1f0   : > { %v805_v58 = vpop.permute.xlu1 %804  ;;  %v795_v59 = vpop.permute.xlu0 %794 }
 0x1f4   : > { %v810_v60 = vpop.permute.xlu1 %809  ;;  %v800_v61 = vpop.permute.xlu0 %799 }
 0x1f8   : > { %v820_v62 = vpop.permute.xlu1 %819  ;;  %v815_v63 = vpop.permute.xlu0 %814 }
 0x1fc   : > { %v830_v0 = vpop.permute.xlu1 %829  ;;  %v825_v1 = vpop.permute.xlu0 %824 }
 0x200   : > { %v840_v2 = vpop.permute.xlu1 %839  ;;  %v835_v3 = vpop.permute.xlu0 %834 }
 0x204   : > { %v850_v4 = vpop.permute.xlu1 %849  ;;  %v845_v5 = vpop.permute.xlu0 %844 }
 0x208   : > { %v860_v6 = vpop.permute.xlu1 %859  ;;  %v855_v7 = vpop.permute.xlu0 %854 }
 0x20e   : > { %v870_v28 = vpop.permute.xlu1 %869  ;;  %v865_v29 = vpop.permute.xlu0 %864 }
 0x260   : > { %v1433_v8 = vpop.f32.mrb[0].mxu0  ;;  %v1441_v9 = vpop.f32.mrb[0].mxu1 }
 0x261   : > { %v713_v10 = vpop.f32.mrb[1].mxu0  ;;  %v745_v11 = vpop.f32.mrb[1].mxu1  ;;  %v874_v14 = vmul.f32 %v1433_v8, %v805_v58  ;;  %v882_v15 = vmul.f32 %v1441_v9, %v845_v5 }
 0x262   : > { %v1434_v12 = vpop.f32.mrb[2].mxu0  ;;  %v1442_v13 = vpop.f32.mrb[2].mxu1  ;;  %v872_v20 = vmul.f32 %v795_v59, %v713_v10  ;;  %v880_v21 = vmul.f32 %v835_v3, %v745_v11 }
 0x263   : > { %v875_v16 = vmul.f32 %v1434_v12, %v810_v60  ;;  %v883_v17 = vmul.f32 %v1442_v13, %v850_v4  ;;  %v716_v18 = vpop.f32.mrb[3].mxu0  ;;  %v748_v19 = vpop.f32.mrb[3].mxu1 }
 0x264   : > { %v873_v22 = vmul.f32 %v800_v61, %v716_v18  ;;  %v881_v23 = vmul.f32 %v840_v2, %v748_v19 }
 0x265   : > { %v889_v24 = vpack.c.bf16 %v875_v16, %v874_v14  ;;  %v893_v25 = vpack.c.bf16 %v883_v17, %v882_v15 }
 0x266   : > { %v888_v26 = vpack.c.bf16 %v873_v22, %v872_v20  ;;  %v892_v27 = vpack.c.bf16 %v881_v23, %v880_v21 }
 0x267   : > { %897 = vst [vmem:[#allocation3 + $0x8] sm:$0xff] %v889_v24  ;;  %901 = vst [vmem:[#allocation3 + $0x28] sm:$0xff] %v893_v25 }
 0x268   : > { %896 = vst [vmem:[#allocation3] sm:$0xff] %v888_v26  ;;  %900 = vst [vmem:[#allocation3 + $0x20] sm:$0xff] %v892_v27  ;;  %v1437_v30 = vpop.f32.mrb[4].mxu0  ;;  %v1445_v31 = vpop.f32.mrb[4].mxu1 }
 0x269   : > { %v729_v32 = vpop.f32.mrb[5].mxu0  ;;  %v761_v33 = vpop.f32.mrb[5].mxu1  ;;  %v878_v36 = vmul.f32 %v1437_v30, %v825_v1  ;;  %v886_v37 = vmul.f32 %v1445_v31, %v865_v29 }
 0x26a   : > { %v1438_v34 = vpop.f32.mrb[6].mxu0  ;;  %v1446_v35 = vpop.f32.mrb[6].mxu1  ;;  %v876_v42 = vmul.f32 %v815_v63, %v729_v32  ;;  %v884_v43 = vmul.f32 %v855_v7, %v761_v33 }
 0x26b   : > { %v879_v38 = vmul.f32 %v1438_v34, %v830_v0  ;;  %v887_v39 = vmul.f32 %v1446_v35, %v870_v28  ;;  %v732_v40 = vpop.f32.mrb[7].mxu0  ;;  %v764_v41 = vpop.f32.mrb[7].mxu1 }
 0x26c   : > { %v877_v44 = vmul.f32 %v820_v62, %v732_v40  ;;  %v885_v45 = vmul.f32 %v860_v6, %v764_v41 }
 0x26d   : > { %v891_v46 = vpack.c.bf16 %v879_v38, %v878_v36  ;;  %v895_v47 = vpack.c.bf16 %v887_v39, %v886_v37 }
 0x26e   : > { %v890_v48 = vpack.c.bf16 %v877_v44, %v876_v42  ;;  %v894_v49 = vpack.c.bf16 %v885_v45, %v884_v43 }
 0x26f   : > { %899 = vst [vmem:[#allocation3 + $0x18] sm:$0xff] %v891_v46  ;;  %903 = vst [vmem:[#allocation3 + $0x38] sm:$0xff] %v895_v47 }
 0x270   : > { %898 = vst [vmem:[#allocation3 + $0x10] sm:$0xff] %v890_v48  ;;  %902 = vst [vmem:[#allocation3 + $0x30] sm:$0xff] %v894_v49 }
 0x271 PF: > { %v921_v50 = vld [vmem:[#allocation3] sm:$0xff]  ;;  %v922_v51 = vld [vmem:[#allocation3 + $0x8] sm:$0xff]  ;;  %v2133_v54 = vld [vmem:[#allocation5 + $0x10] sm:$0xff]  ;;  %v1785_v57 = vmov 0   ;;  %p1326_p1 = scmp.ge.s32.totalorder %s1767_s21, 2 }
 0x272   : > { %1447 = vmatprep.subr.bf16.mxu0 %v921_v50  ;;  %1511 = vmatprep.subr.bf16.mxu1 %v921_v50  ;;  %v2130_v52 = vld [vmem:[#allocation5] sm:$0xff]  ;;  %v917_v56 = vunpack.c.l.s8.bf16 %v2133_v54  ;;  %v1029_v58 = vld [vmem:[%s2270_s4 + $0x10] sm:$0xff]  ;;  %v1030_v60 = vld [vmem:[%s2270_s4 + $0x18] sm:$0xff]  ;;  %v918_v15 = vunpack.c.h.s8.bf16 %v2133_v54 }
 0x273   : > { %1448 = vmatpush3.bf16.msra.mxu0 %v921_v50  ;;  %1519 = vmatpush3.bf16.msra.mxu1 %v921_v50  ;;  %v913_v53 = vunpack.c.l.s8.bf16 %v2130_v52  ;;  %v1027_v59 = vld [vmem:[%s2270_s4] sm:$0xff]  ;;  %v1028_v62 = vld [vmem:[%s2270_s4 + $0x8] sm:$0xff]  ;;  %v1034_v2 = vld [vmem:[%s2270_s4 + $0x38] sm:$0xff]  ;;  %v914_v14 = vunpack.c.h.s8.bf16 %v2130_v52 }
 0x274   : > { %1449 = vmatprep.subr.bf16.mxu0 %v922_v51  ;;  %1512 = vmatprep.subr.bf16.mxu1 %v922_v51  ;;  %v1032_v63 = vld [vmem:[%s2270_s4 + $0x28] sm:$0xff]  ;;  %v925_v0 = vld [vmem:[#allocation3 + $0x20] sm:$0xff]  ;;  %v1033_v4 = vld [vmem:[%s2270_s4 + $0x30] sm:$0xff] }
 0x275   : > { %1630 = vset.pattern.permute.xlu1 %v1785_v57  ;;  %1629 = vset.pattern.permute.xlu0 %v1785_v57  ;;  %v1031_v1 = vld [vmem:[%s2270_s4 + $0x20] sm:$0xff]  ;;  %v926_v3 = vld [vmem:[#allocation3 + $0x28] sm:$0xff]  ;;  %v1038_v8 = vld [vmem:[%s2270_s4 + $0x58] sm:$0xff] }
 0x276   : > { %1463 = vmatprep.mubr.bf16.mxu0 %v913_v53  ;;  %1055 = vperm.xlu1 %1630, %v1029_v58   ;;  %v924_v61 = vld [vmem:[#allocation3 + $0x18] sm:$0xff]  ;;  %v1036_v5 = vld [vmem:[%s2270_s4 + $0x48] sm:$0xff]  ;;  %v1035_v7 = vld [vmem:[%s2270_s4 + $0x40] sm:$0xff] }
 0x277   : > { %v923_v55 = vld [vmem:[#allocation3 + $0x10] sm:$0xff]  ;;  %1450 = vmatpush3.bf16.msra.mxu0 %v922_v51  ;;  %1520 = vmatpush3.bf16.msra.mxu1 %v922_v51  ;;  %v928_v9 = vld [vmem:[#allocation3 + $0x38] sm:$0xff]  ;;  %v1040_v11 = vld [vmem:[%s2270_s4 + $0x68] sm:$0xff] }
 0x278   : > { %1451 = vmatprep.subr.bf16.mxu0 %v923_v55  ;;  %1513 = vmatprep.subr.bf16.mxu1 %v923_v55  ;;  %v927_v6 = vld [vmem:[#allocation3 + $0x30] sm:$0xff]  ;;  %v910_v12 = vld [vmem:[#allocation5 + $0x8] sm:$0xff]  ;;  %v912_v13 = vld [vmem:[#allocation5 + $0x18] sm:$0xff] }
 0x279   : > { %1471 = vmatprep.mubr.bf16.mxu1 %v917_v56  ;;  %1045 = vperm.xlu0 %1629, %v1027_v59   ;;  %v1037_v10 = vld [vmem:[%s2270_s4 + $0x50] sm:$0xff]  ;;  %v1039_v16 = vld [vmem:[%s2270_s4 + $0x60] sm:$0xff]  ;;  %v915_v17 = vunpack.c.l.s8.bf16 %v910_v12  ;;  %v919_v18 = vunpack.c.l.s8.bf16 %v912_v13  ;;  %v1042_v19 = vld [vmem:[%s2270_s4 + $0x78] sm:$0xff]  ;;  %v916_v21 = vunpack.c.h.s8.bf16 %v910_v12  ;;  %v920_v22 = vunpack.c.h.s8.bf16 %v912_v13 }
 0x27a   : > { %1060 = vperm.xlu1 %1630, %v1030_v60   ;;  %v1041_v20 = vld [vmem:[%s2270_s4 + $0x70] sm:$0xff] }
 0x27b   : > { %1452 = vmatpush3.bf16.msra.mxu0 %v923_v55  ;;  %1521 = vmatpush3.bf16.msra.mxu1 %v923_v55 }
 0x27c   : > { %1453 = vmatprep.subr.bf16.mxu0 %v924_v61  ;;  %1514 = vmatprep.subr.bf16.mxu1 %v924_v61 }
 0x27d   : > { %1050 = vperm.xlu0 %1629, %v1028_v62  }
 0x27e   : > { %1070 = vperm.xlu1 %1630, %v1032_v63  }
 0x27f   : > { %1454 = vmatpush3.bf16.msra.mxu0 %v924_v61  ;;  %1522 = vmatpush3.bf16.msra.mxu1 %v924_v61 }
 0x280   : > { %1455 = vmatprep.subr.bf16.mxu0 %v925_v0  ;;  %1515 = vmatprep.subr.bf16.mxu1 %v925_v0 }
 0x281   : > { %1065 = vperm.xlu0 %1629, %v1031_v1  }
 0x282   : > { %1080 = vperm.xlu1 %1630, %v1034_v2  }
 0x283   : > { %1456 = vmatpush3.bf16.msra.mxu0 %v925_v0  ;;  %1523 = vmatpush3.bf16.msra.mxu1 %v925_v0 }
 0x284   : > { %1457 = vmatprep.subr.bf16.mxu0 %v926_v3  ;;  %1516 = vmatprep.subr.bf16.mxu1 %v926_v3 }
 0x285   : > { %1075 = vperm.xlu0 %1629, %v1033_v4  }
 0x286   : > { %1090 = vperm.xlu1 %1630, %v1036_v5  }
 0x287   : > { %1458 = vmatpush3.bf16.msra.mxu0 %v926_v3  ;;  %1524 = vmatpush3.bf16.msra.mxu1 %v926_v3 }
 0x288   : > { %1459 = vmatprep.subr.bf16.mxu0 %v927_v6  ;;  %1517 = vmatprep.subr.bf16.mxu1 %v927_v6 }
 0x289   : > { %1085 = vperm.xlu0 %1629, %v1035_v7  }
 0x28a   : > { %1100 = vperm.xlu1 %1630, %v1038_v8  }
 0x28b   : > { %1460 = vmatpush3.bf16.msra.mxu0 %v927_v6  ;;  %1525 = vmatpush3.bf16.msra.mxu1 %v927_v6 }
 0x28c   : > { %1461 = vmatprep.subr.bf16.mxu0 %v928_v9  ;;  %1518 = vmatprep.subr.bf16.mxu1 %v928_v9 }
 0x28d   : > { %1095 = vperm.xlu0 %1629, %v1037_v10  }
 0x28e   : > { %1110 = vperm.xlu1 %1630, %v1040_v11  }
 0x28f   : > { %1462 = vmatpush3.bf16.msra.mxu0 %v928_v9  ;;  %1526 = vmatpush3.bf16.msra.mxu1 %v928_v9 }
 0x291   : > { %1105 = vperm.xlu0 %1629, %v1039_v16  }
 0x292   : > { %1464 = vmatmul.mubr.bf16.vlgmr.msra.gmra.mrb[0].mxu0 %v914_v14  ;;  %1472 = vmatmul.mubr.bf16.vlgmr.msra.gmra.mrb[0].mxu1 %v918_v15 }
 0x293   : > { %1467 = vmatprep.mubr.bf16.mxu0 %v915_v17  ;;  %1475 = vmatprep.mubr.bf16.mxu1 %v919_v18 }
 0x294   : > { %1120 = vperm.xlu1 %1630, %v1042_v19  }
 0x295   : > { %1115 = vperm.xlu0 %1629, %v1041_v20  }
 0x29a   : > { %1468 = vmatmul.mubr.bf16.gmra.mrb[4].mxu0 %v916_v21  ;;  %1476 = vmatmul.mubr.bf16.gmra.mrb[4].mxu1 %v920_v22 }
 0x2f5   : > { %v1056_v23 = vpop.permute.xlu1 %1055 }
 0x2f8   : > { %v1046_v24 = vpop.permute.xlu0 %1045 }
 0x2f9   : > { %v1061_v25 = vpop.permute.xlu1 %1060 }
 0x2fc   : > { %v1051_v26 = vpop.permute.xlu0 %1050 }
 0x2fd   : > { %v1071_v27 = vpop.permute.xlu1 %1070 }
 0x300   : > { %v1066_v28 = vpop.permute.xlu0 %1065 }
 0x301   : > { %v1081_v29 = vpop.permute.xlu1 %1080 }
 0x304   : > { %v1076_v30 = vpop.permute.xlu0 %1075 }
 0x305   : > { %v1091_v31 = vpop.permute.xlu1 %1090 }
 0x308   : > { %v1086_v32 = vpop.permute.xlu0 %1085 }
 0x309   : > { %v1101_v33 = vpop.permute.xlu1 %1100 }
 0x30c   : > { %v1096_v34 = vpop.permute.xlu0 %1095 }
 0x30d   : > { %v1111_v35 = vpop.permute.xlu1 %1110 }
 0x310   : > { %v1106_v36 = vpop.permute.xlu0 %1105 }
 0x313   : > { %v1121_v53 = vpop.permute.xlu1 %1120 }
 0x314   : > { %v1116_v54 = vpop.permute.xlu0 %1115 }
 0x365   : > { %v1465_v37 = vpop.f32.mrb[0].mxu0  ;;  %v1473_v38 = vpop.f32.mrb[0].mxu1 }
 0x366   : > { %v2186_v39 = vmul.f32 %v1465_v37, %v1056_v23  ;;  %v2188_v40 = vmul.f32 %v1473_v38, %v1096_v34  ;;  %v963_v41 = vpop.f32.mrb[1].mxu0  ;;  %v995_v42 = vpop.f32.mrb[1].mxu1 }
 0x367   : > { %v2190_v43 = vmul.f32 %v1046_v24, %v963_v41  ;;  %v2192_v44 = vmul.f32 %v1086_v32, %v995_v42  ;;  %v1466_v45 = vpop.f32.mrb[2].mxu0  ;;  %v1474_v46 = vpop.f32.mrb[2].mxu1 }
 0x368   : > { %v2194_v47 = vmul.f32 %v1466_v45, %v1061_v25  ;;  %v2196_v48 = vmul.f32 %v1474_v46, %v1101_v33  ;;  %v966_v49 = vpop.f32.mrb[3].mxu0  ;;  %v998_v50 = vpop.f32.mrb[3].mxu1  ;;  %v1145_v9 = vmax.f32 (!%p1326_p1), %v2186_v39, 0.0  ;;  %v1153_v21 = vmax.f32 (!%p1326_p1), %v2188_v40, 0.0 }
 0x369   : > { %v1124_v51 = vmul.f32 %v1051_v26, %v966_v49  ;;  %v2198_v52 = vmul.f32 %v1091_v31, %v998_v50  ;;  %v1143_v7 = vmax.f32 (!%p1326_p1), %v2190_v43, 0.0  ;;  %v1151_v17 = vmax.f32 (!%p1326_p1), %v2192_v44, 0.0 }
 0x36a   : > { %v1146_v10 = vmax.f32 (!%p1326_p1), %v2194_v47, 0.0  ;;  %v1154_v22 = vmax.f32 (!%p1326_p1), %v2196_v48, 0.0 }
 0x36b   : > { %1142 = sbr.rel (%p1326_p1) target bundleno = 888 (0x378), region = 91  ;;  %v1144_v8 = vmax.f32 (!%p1326_p1), %v1124_v51, 0.0  ;;  %v1152_v18 = vmax.f32 (!%p1326_p1), %v2198_v52, 0.0 }
 0x36c   : > { %v1160_v16 = vpack.c.bf16 (!%p1326_p1), %v1146_v10, %v1145_v9 }
 0x36d   : > { %v1469_v55 = vpop.f32.mrb[4].mxu0  ;;  %v1477_v56 = vpop.f32.mrb[4].mxu1  ;;  %v1159_v15 = vpack.c.bf16 (!%p1326_p1), %v1144_v8, %v1143_v7  ;;  %v1163_v23 = vpack.c.bf16 (!%p1326_p1), %v1152_v18, %v1151_v17 }
 0x36e   : > { %v1129_v57 = vmul.f32 %v1469_v55, %v1076_v30  ;;  %v2200_v58 = vmul.f32 %v1477_v56, %v1116_v54  ;;  %v979_v59 = vpop.f32.mrb[5].mxu0  ;;  %v1011_v60 = vpop.f32.mrb[5].mxu1  ;;  %1172 = vst [vmem:[#allocation2 + $0x8] sm:$0xff] (!%p1326_p1), %v1160_v16 }
 0x36f   : > { %v1127_v61 = vmul.f32 %v1066_v28, %v979_v59  ;;  %v1135_v62 = vmul.f32 %v1106_v36, %v1011_v60  ;;  %v1470_v63 = vpop.f32.mrb[6].mxu0  ;;  %v1478_v0 = vpop.f32.mrb[6].mxu1  ;;  %1171 = vst [vmem:[#allocation2] sm:$0xff] (!%p1326_p1), %v1159_v15  ;;  %1175 = vst [vmem:[#allocation2 + $0x20] sm:$0xff] (!%p1326_p1), %v1163_v23 }
 0x370   : > { %v1130_v1 = vmul.f32 %v1470_v63, %v1081_v29  ;;  %v1138_v2 = vmul.f32 %v1478_v0, %v1121_v53  ;;  %v982_v3 = vpop.f32.mrb[7].mxu0  ;;  %v1014_v4 = vpop.f32.mrb[7].mxu1  ;;  %v1149_v13 = vmax.f32 (!%p1326_p1), %v1129_v57, 0.0  ;;  %v1157_v26 = vmax.f32 (!%p1326_p1), %v2200_v58, 0.0 }
 0x371   : > { %v1128_v5 = vmul.f32 %v1071_v27, %v982_v3  ;;  %v1136_v6 = vmul.f32 %v1111_v35, %v1014_v4  ;;  %v1147_v11 = vmax.f32 (!%p1326_p1), %v1127_v61, 0.0  ;;  %v1155_v24 = vmax.f32 (!%p1326_p1), %v1135_v62, 0.0 }
 0x372   : > { %v1150_v14 = vmax.f32 %v1130_v1, 0.0  ;;  %v1164_v27 = vpack.c.bf16 %v1154_v22, %v1153_v21  ;;  %v1158_v28 = vmax.f32 %v1138_v2, 0.0 }
 0x373   : > { %v1148_v12 = vmax.f32 %v1128_v5, 0.0  ;;  %v1156_v25 = vmax.f32 %v1136_v6, 0.0 }
 0x374   : > { %v1162_v20 = vpack.c.bf16 %v1150_v14, %v1149_v13  ;;  %1176 = vst [vmem:[#allocation2 + $0x28] sm:$0xff] %v1164_v27  ;;  %v1166_v30 = vpack.c.bf16 %v1158_v28, %v1157_v26 }
 0x375   : > { %v1161_v19 = vpack.c.bf16 %v1148_v12, %v1147_v11  ;;  %v1165_v29 = vpack.c.bf16 %v1156_v25, %v1155_v24 }
 0x376   : > { %1174 = vst [vmem:[#allocation2 + $0x18] sm:$0xff] %v1162_v20  ;;  %1178 = vst [vmem:[#allocation2 + $0x38] sm:$0xff] %v1166_v30 }
 0x377   : > { %1173 = vst [vmem:[#allocation2 + $0x10] sm:$0xff] %v1161_v19  ;;  %1177 = vst [vmem:[#allocation2 + $0x30] sm:$0xff] %v1165_v29 }
 0x378 PF: > { %p1327_p5 = scmp.ne.s32.totalorder %s1767_s21, 2 }
 0x379   : > { %1183 = vst [vmem:[#allocation10] sm:$0xff] (!%p1327_p5), %v2190_v43  ;;  %1184 = vst [vmem:[#allocation10 + $0x8] sm:$0xff] (!%p1327_p5), %v1124_v51 }
 0x37a   : > { %1182 = sbr.rel (%p1327_p5) target bundleno = 897 (0x381), region = 95  ;;  %1185 = vst [vmem:[#allocation10 + $0x10] sm:$0xff] (!%p1327_p5), %v2186_v39  ;;  %1186 = vst [vmem:[#allocation10 + $0x18] sm:$0xff] (!%p1327_p5), %v2194_v47 }
 0x37b   : > { %1187 = vst [vmem:[#allocation10 + $0x20] sm:$0xff] (!%p1327_p5), %v1127_v61  ;;  %1188 = vst [vmem:[#allocation10 + $0x28] sm:$0xff] (!%p1327_p5), %v1128_v5 }
 0x37c   : > { %1189 = vst [vmem:[#allocation10 + $0x30] sm:$0xff] (!%p1327_p5), %v1129_v57  ;;  %1190 = vst [vmem:[#allocation10 + $0x38] sm:$0xff] (!%p1327_p5), %v1130_v1 }
 0x37d   : > { %1191 = vst [vmem:[#allocation10 + $0x40] sm:$0xff] (!%p1327_p5), %v2192_v44  ;;  %1192 = vst [vmem:[#allocation10 + $0x48] sm:$0xff] (!%p1327_p5), %v2198_v52 }
 0x37e   : > { %1193 = vst [vmem:[#allocation10 + $0x50] sm:$0xff] (!%p1327_p5), %v2188_v40  ;;  %1194 = vst [vmem:[#allocation10 + $0x58] sm:$0xff] (!%p1327_p5), %v2196_v48 }
 0x37f   : > { %1195 = vst [vmem:[#allocation10 + $0x60] sm:$0xff] (!%p1327_p5), %v1135_v62  ;;  %1196 = vst [vmem:[#allocation10 + $0x68] sm:$0xff] (!%p1327_p5), %v1136_v6 }
 0x380   : > { %1197 = vst [vmem:[#allocation10 + $0x70] sm:$0xff] (!%p1327_p5), %v2200_v58  ;;  %1198 = vst [vmem:[#allocation10 + $0x78] sm:$0xff] (!%p1327_p5), %v1138_v2 }
 0x381 PF: > { %p2222_p8 = scmp.eq.s32.totalorder %s1298_s24, 2  ;;  %s1786_s28 = smov [#allocation10]  }
 0x382   : > { %s1208_s7 = sshll.u32 %s1786_s28, 4  ;;  %s1209_s7 = int_to_ptr.vmem [resolvable:$true] %s1208_s7 }
 0x383   : > { %s1689_s9 = scalar_lea.vmem %s1209_s7, 2048  ;;  %p1696_p13 = scmp.lt.s32.totalorder %s1209_s7, %s1209_s7 }
 0x384   : > { %p1690_p9 = scmp.ne.s32.totalorder %s1209_s7, %s1689_s9  ;;  %p1697_p2 = scmp.lt.s32.totalorder %s1689_s9, %s1689_s9 }
 0x386   : > { %p1691_p10 = pnand %p1690_p9, %p2222_p8  ;;  %p1698_p3 = por %p1697_p2, %p1696_p13 }
 0x388   : > { %p1692_p11 = pneg %p1691_p10 }
 0x38a   : > { %p1699_p12 = pnand %p1698_p3, %p1692_p11 }
 0x38c   : > { %1702 = shalt.err (!%p1699_p12)
}
 0x38d   : > { %s1703_s24 = scalar_lea.hbm %s2271_s5, 2048 }
 0x38e   : > { %p1704_p0 = scmp.ne.s32.totalorder %s2271_s5, %s1703_s24  ;;  %p1709_p4 = scmp.lt.u32.totalorder %s1703_s24, %s2271_s5 }
 0x390   : > { %p1705_p6 = pnand %p1704_p0, %p2222_p8 }
 0x392   : > { %p1706_p7 = pneg %p1705_p6 }
 0x394   : > { %p1711_p1 = pnand %p1709_p4, %p1706_p7 }
 0x396   : > { %1714 = shalt.err (!%p1711_p1)
}
 0x397   : > { %s1787_s10 = smov 128   ;;  %s1788_s8 = smov 8  }
 0x398   : > { %1534 = dma.vmem_to_hbm [thread:$0]  (%p2222_p8), %s1209_s7, 2048, %s2271_s5, [#allocation7], %s1787_s10, %s1787_s10, %s1788_s8  }
 0x399   : > { %1750 = dma.done.wait (%p2222_p8), [#allocation7], 2048  }
 0x39a   : > { %1752 = vsyncadd (%p2222_p8), [#allocation7], 4294965248 }
 0x39b PF: > { %s20_s23 = sadd.s32 1, %s1775_s23   ;;  %s2285_s18 = smov %s1759_s19 }
 0x39c   : > { %p17_p5 = scmp.ge.s32.totalorder %s20_s23, 5   ;;  %s2286_s19 = smov %s1763_s20 }
 0x39d   : > { %s2287_s20 = smov %s1904_s11  ;;  %s2288_s21 = smov %s1771_s22 }
 0x39e   : > { %s2289_s22 = smov %s2291_s6  ;;  %19 = sbr.rel (!%p17_p5) target bundleno = 6 (0x6), region = 141 }
 0x3a5   :  { %1224 = vsyncpa [#allocation6], 1 }
 0x3a6   :  { %1226 = vsyncpa [#allocation6 + $0x1], 1 }
 0x3a7   :  { %1227 = vsyncpa [#allocation9], 1 }
 0x3a8   :  { %1229 = vsyncpa [#allocation9 + $0x1], 1 }
 0x3a9   :  { %1230 = vsyncpa [#allocation7], 1 }
 0x3aa   :  { %1232 = vsyncpa [#allocation7 + $0x1], 1 }

</bundles_post_ra>
